<compile_context>
chip_gen: v5e
topology: v5e:2x2
jax: 0.10.0
libtpu: 0.0.40
codegen_flags: <defaults>
</compile_context>

<pallas_src>
import functools

import jax
import jax.numpy as jnp
import numpy as np
from jax.experimental import pallas as pl
from jax.experimental.pallas import tpu as pltpu


def hd_inverse_kernel(x_ref, w1t_ref, b1_ref, w2t_ref, b2_ref,
                      w2s_ref, w1s_ref, o_ref):
    """Analytic grad of a 2-hidden-layer tanh MLP Hamiltonian, with the
    symplectic (-dp, dq) reassembly folded into the final weight matrix.
    Matmul operands use the weights' dtype (f32 or bf16); accumulation and
    all elementwise math stay f32."""
    w_dtype = w1t_ref.dtype
    x = x_ref[...].astype(w_dtype)                                   # (TB, Dp)

    # Forward pass (activations needed for the chain rule).
    z1 = jnp.dot(x, w1t_ref[...],
                 preferred_element_type=jnp.float32) + b1_ref[...]   # (TB, H1p)
    a1 = jnp.tanh(z1)
    z2 = jnp.dot(a1.astype(w_dtype), w2t_ref[...],
                 preferred_element_type=jnp.float32) + b2_ref[...]   # (TB, H2p)
    a2 = jnp.tanh(z2)

    # Backward chain rule.  w2s = diag(w3) @ W2 already folds the output
    # weights in, so g1 = (1 - a1^2) * ((1 - a2^2) @ w2s).
    g1 = (1.0 - a1 * a1) * jnp.dot((1.0 - a2 * a2).astype(w_dtype), w2s_ref[...],
                                   preferred_element_type=jnp.float32)

    # w1s = concat([-W1[:, D/2:], W1[:, :D/2]], axis=1): the matmul directly
    # produces cat((-dp, dq)) — no lane slicing / concat / negate needed.
    o_ref[...] = jnp.dot(g1.astype(w_dtype), w1s_ref[...],
                         preferred_element_type=jnp.float32).astype(o_ref.dtype)


def prepare_params(params, pack, operand_dtype):
    """One-time layout plumbing: transpose, fold w3 into W2, fold the
    symplectic swap into W1, then block-diagonalize everything `pack` times
    (kron(I_pack, .)) for the lane-dense 128-wide packing."""
    w1, b1, w2, b2, w3 = params
    h1, d = w1.shape
    h2 = w2.shape[0]
    assert d % 2 == 0, "phase-space dim must be even (q, p halves)"
    half = d // 2

    w1t = jnp.transpose(w1)                                    # (D,  H1)
    w2t = jnp.transpose(w2)                                    # (H1, H2)
    w2s = w3.reshape(h2, 1) * w2                               # (H2, H1) = diag(w3) @ W2
    w1_sym = jnp.concatenate([-w1[:, half:], w1[:, :half]], axis=1)  # (H1, D)

    eye = jnp.eye(pack, dtype=jnp.float32)
    w1t_bd = jnp.kron(eye, w1t).astype(operand_dtype)          # (pack*D,  pack*H1)
    w2t_bd = jnp.kron(eye, w2t).astype(operand_dtype)          # (pack*H1, pack*H2)
    w2s_bd = jnp.kron(eye, w2s).astype(operand_dtype)          # (pack*H2, pack*H1)
    w1s_bd = jnp.kron(eye, w1_sym).astype(operand_dtype)       # (pack*H1, pack*D)
    b1_t = jnp.tile(b1, (1, pack)).astype(jnp.float32)         # (1, pack*H1)
    b2_t = jnp.tile(b2, (1, pack)).astype(jnp.float32)         # (1, pack*H2)
    return (w1t_bd, b1_t, w2t_bd, b2_t, w2s_bd, w1s_bd)


@functools.partial(jax.jit,
                   static_argnames=("max_tb", "operand_dtype", "out_dtype"))
def hd_inverse_net(t, x, params, *, max_tb=512,
                   operand_dtype=jnp.float32, out_dtype=None):
    """Wrapper mimicking HDInverseNet.forward(t, x); `t` is unused (as in the
    reference module)."""
    del t
    B, D = x.shape
    out_dtype = x.dtype if out_dtype is None else out_dtype

    # Lane-dense packing: put `pack` original rows into one 128-lane row.
    if D < 128 and 128 % D == 0 and B % (128 // D) == 0:
        pack = 128 // D
    else:
        pack = 1
    Bp = B // pack
    Dp = D * pack

    w1t, b1, w2t, b2, w2s, w1s = prepare_params(params, pack, operand_dtype)
    H1p = w1t.shape[1]
    H2p = w2t.shape[1]

    xp = x.reshape(Bp, Dp)                      # contiguous row-major: free
    if xp.dtype != operand_dtype:
        xp = xp.astype(operand_dtype)           # halves x DMA for bf16

    # Batch tiling: big tiles amortize per-grid-step overhead; keep >= 2 grid
    # steps when possible so the "parallel" axis can shard across v7x's two
    # TensorCores.  No padding: the ragged last block is handled by Pallas.
    if Bp <= 8:
        tb = Bp                                  # single full-array block
    else:
        tb = min(max_tb, pl.cdiv(pl.cdiv(Bp, 2), 8) * 8)
    nb = pl.cdiv(Bp, tb)

    batch_spec = pl.BlockSpec((tb, Dp), lambda i: (i, 0))

    def const_spec(shape):
        # Weights / biases: same block every grid step -> VMEM resident.
        return pl.BlockSpec(shape, lambda i: (0, 0))

    rows = nb * tb
    op_bytes = np.dtype(operand_dtype).itemsize
    cost = pl.CostEstimate(
        flops=2 * rows * (Dp * H1p + H1p * H2p + H2p * H1p + H1p * Dp),
        transcendentals=rows * (H1p + H2p),
        bytes_accessed=(op_bytes * B * D
                        + np.dtype(out_dtype).itemsize * B * D
                        + op_bytes * (Dp * H1p + H1p * H2p + H2p * H1p + H1p * Dp)
                        + 4 * (H1p + H2p)),
    )

    out = pl.pallas_call(
        hd_inverse_kernel,
        out_shape=jax.ShapeDtypeStruct((Bp, Dp), out_dtype),
        grid_spec=pltpu.PrefetchScalarGridSpec(
            num_scalar_prefetch=0,
            grid=(nb,),
            in_specs=[
                batch_spec,                 # x (packed)
                const_spec((Dp, H1p)),      # block-diag W1^T
                const_spec((1, H1p)),       # b1 (tiled)
                const_spec((H1p, H2p)),     # block-diag W2^T
                const_spec((1, H2p)),       # b2 (tiled)
                const_spec((H2p, H1p)),     # block-diag diag(w3) @ W2
                const_spec((H1p, Dp)),      # block-diag W1 with symplectic swap
            ],
            out_specs=batch_spec,
        ),
        compiler_params=pltpu.CompilerParams(
            dimension_semantics=("parallel",)),
        cost_estimate=cost,
    )(xp, w1t, b1, w2t, b2, w2s, w1s)

    return out.reshape(B, D)                    # contiguous: free


def make_hnet_params(key, dim, h1, h2):
    """Deterministic synthetic hnet parameters (Linear/Tanh/Linear/Tanh/Linear)."""
    k1, k2, k3, k4, k5 = jax.random.split(key, 5)
    w1 = jax.random.normal(k1, (h1, dim), jnp.float32) * 0.2
    b1 = jax.random.normal(k2, (1, h1), jnp.float32) * 0.1
    w2 = jax.random.normal(k3, (h2, h1), jnp.float32) * 0.2
    b2 = jax.random.normal(k4, (1, h2), jnp.float32) * 0.1
    w3 = jax.random.normal(k5, (1, h2), jnp.float32) * 0.2
    return (w1, b1, w2, b2, w3)


def hd_inverse_ref(x, params):
    """Pure-JAX reference using autodiff, mirroring the PyTorch semantics."""
    w1, b1, w2, b2, w3 = params

    def hamiltonian_sum(y):
        a1 = jnp.tanh(y @ w1.T + b1)
        a2 = jnp.tanh(a1 @ w2.T + b2)
        return jnp.sum(a2 @ w3.T)   # H.sum(); final bias drops out of the grad

    dH = jax.grad(hamiltonian_sum)(x)
    dq, dp = jnp.split(dH, 2, axis=1)
    return jnp.concatenate([-dp, dq], axis=1)


if __name__ == "__main__":
    key = jax.random.PRNGKey(0)
    kx, kp, kx2 = jax.random.split(key, 3)

    D = 32                # phase space: q, p each of dim 16
    H1, H2 = 64, 64       # hidden widths of the synthetic hnet
    params = make_hnet_params(kp, D, H1, H2)
    t = jnp.float32(0.0)  # unused, present for interface parity

    # Small batch: packs to (2, 128), single full-array block (grid of 1).
    B = 8
    x = jax.random.normal(kx, (B, D), jnp.float32)
    out = jax.block_until_ready(hd_inverse_net(t, x, params))
    ref = hd_inverse_ref(x, params)
    assert out.shape == (B, D)
    assert np.allclose(np.asarray(out), np.asarray(ref), atol=1e-4, rtol=1e-4)

    # Larger batch: packs to (64, 128), two parallel grid steps (v7x-friendly),
    # lane-dense stores, weights VMEM-resident, no pad/slice copies.
    B2 = 256
    x2 = jax.random.normal(kx2, (B2, D), jnp.float32)
    out2 = jax.block_until_ready(hd_inverse_net(t, x2, params))
    ref2 = hd_inverse_ref(x2, params)
    assert out2.shape == (B2, D)
    assert np.allclose(np.asarray(out2), np.asarray(ref2), atol=1e-4, rtol=1e-4)

    # bf16 matmul-operand path (f32 accumulation, f32 elementwise math):
    # loose tolerance, demonstrates the v6e/v7x throughput configuration.
    out_bf = jax.block_until_ready(
        hd_inverse_net(t, x2, params, operand_dtype=jnp.bfloat16))
    assert out_bf.shape == (B2, D)
    assert np.allclose(np.asarray(out_bf), np.asarray(ref2), atol=5e-2, rtol=5e-2)

    print("KERNEL_OK")
</pallas_src>

<mosaic_0001>
module attributes {stable_mosaic.version = 11 : i64} {
  func.func @hd_inverse_kernel(%arg0: i32, %arg1: memref<2x128xf32, #tpu.memory_space<vmem>>, %arg2: memref<128x256xf32, #tpu.memory_space<vmem>>, %arg3: memref<1x256xf32, #tpu.memory_space<vmem>>, %arg4: memref<256x256xf32, #tpu.memory_space<vmem>>, %arg5: memref<1x256xf32, #tpu.memory_space<vmem>>, %arg6: memref<256x256xf32, #tpu.memory_space<vmem>>, %arg7: memref<256x128xf32, #tpu.memory_space<vmem>>, %arg8: memref<2x128xf32, #tpu.memory_space<vmem>>) attributes {dimension_semantics = [#tpu.dimension_semantics<parallel>], iteration_bounds = array<i64: 1>, scalar_prefetch = 0 : i64, scratch_operands = 0 : i64, tpu.core_type = #tpu.core_type<tc>, window_params = [{transform_indices = @transform_0, window_bounds = array<i64: 2, 128>}, {pipeline_mode = #tpu.pipeline_mode<synchronous>, transform_indices = @transform_1, window_bounds = array<i64: 128, 256>}, {pipeline_mode = #tpu.pipeline_mode<synchronous>, transform_indices = @transform_2, window_bounds = array<i64: 1, 256>}, {pipeline_mode = #tpu.pipeline_mode<synchronous>, transform_indices = @transform_3, window_bounds = array<i64: 256, 256>}, {pipeline_mode = #tpu.pipeline_mode<synchronous>, transform_indices = @transform_4, window_bounds = array<i64: 1, 256>}, {pipeline_mode = #tpu.pipeline_mode<synchronous>, transform_indices = @transform_5, window_bounds = array<i64: 256, 256>}, {pipeline_mode = #tpu.pipeline_mode<synchronous>, transform_indices = @transform_6, window_bounds = array<i64: 256, 128>}, {transform_indices = @transform_7, window_bounds = array<i64: 2, 128>}]} {
    %c0 = arith.constant 0 : index
    %c0_0 = arith.constant 0 : index
    %0 = vector.load %arg1[%c0, %c0_0] : memref<2x128xf32, #tpu.memory_space<vmem>>, vector<2x128xf32>
    %c0_1 = arith.constant 0 : index
    %c0_2 = arith.constant 0 : index
    %1 = vector.load %arg2[%c0_1, %c0_2] : memref<128x256xf32, #tpu.memory_space<vmem>>, vector<128x256xf32>
    %cst = arith.constant dense<0.000000e+00> : vector<2x256xf32>
    %2 = tpu.matmul %0, %1, %cst {dimension_numbers = #tpu.dot_dimension_numbers<[1], [0], [0], [1], [0, 0, 1, 1], [], []>} : vector<2x128xf32>, vector<128x256xf32>, vector<2x256xf32> -> vector<2x256xf32>
    %c0_3 = arith.constant 0 : index
    %c0_4 = arith.constant 0 : index
    %3 = vector.load %arg3[%c0_3, %c0_4] : memref<1x256xf32, #tpu.memory_space<vmem>>, vector<1x256xf32>
    %4 = vector.broadcast %3 : vector<1x256xf32> to vector<2x256xf32>
    %5 = arith.addf %2, %4 : vector<2x256xf32>
    %6 = math.tanh %5 : vector<2x256xf32>
    %c0_5 = arith.constant 0 : index
    %c0_6 = arith.constant 0 : index
    %7 = vector.load %arg4[%c0_5, %c0_6] : memref<256x256xf32, #tpu.memory_space<vmem>>, vector<256x256xf32>
    %cst_7 = arith.constant dense<0.000000e+00> : vector<2x256xf32>
    %8 = tpu.matmul %6, %7, %cst_7 {dimension_numbers = #tpu.dot_dimension_numbers<[1], [0], [0], [1], [0, 0, 1, 1], [], []>} : vector<2x256xf32>, vector<256x256xf32>, vector<2x256xf32> -> vector<2x256xf32>
    %c0_8 = arith.constant 0 : index
    %c0_9 = arith.constant 0 : index
    %9 = vector.load %arg5[%c0_8, %c0_9] : memref<1x256xf32, #tpu.memory_space<vmem>>, vector<1x256xf32>
    %10 = vector.broadcast %9 : vector<1x256xf32> to vector<2x256xf32>
    %11 = arith.addf %8, %10 : vector<2x256xf32>
    %12 = math.tanh %11 : vector<2x256xf32>
    %13 = arith.mulf %6, %6 : vector<2x256xf32>
    %cst_10 = arith.constant 1.000000e+00 : f32
    %14 = vector.broadcast %cst_10 : f32 to vector<2x256xf32>
    %15 = arith.subf %14, %13 : vector<2x256xf32>
    %16 = arith.mulf %12, %12 : vector<2x256xf32>
    %cst_11 = arith.constant 1.000000e+00 : f32
    %17 = vector.broadcast %cst_11 : f32 to vector<2x256xf32>
    %18 = arith.subf %17, %16 : vector<2x256xf32>
    %c0_12 = arith.constant 0 : index
    %c0_13 = arith.constant 0 : index
    %19 = vector.load %arg6[%c0_12, %c0_13] : memref<256x256xf32, #tpu.memory_space<vmem>>, vector<256x256xf32>
    %cst_14 = arith.constant dense<0.000000e+00> : vector<2x256xf32>
    %20 = tpu.matmul %18, %19, %cst_14 {dimension_numbers = #tpu.dot_dimension_numbers<[1], [0], [0], [1], [0, 0, 1, 1], [], []>} : vector<2x256xf32>, vector<256x256xf32>, vector<2x256xf32> -> vector<2x256xf32>
    %21 = arith.mulf %15, %20 : vector<2x256xf32>
    %c0_15 = arith.constant 0 : index
    %c0_16 = arith.constant 0 : index
    %22 = vector.load %arg7[%c0_15, %c0_16] : memref<256x128xf32, #tpu.memory_space<vmem>>, vector<256x128xf32>
    %cst_17 = arith.constant dense<0.000000e+00> : vector<2x128xf32>
    %23 = tpu.matmul %21, %22, %cst_17 {dimension_numbers = #tpu.dot_dimension_numbers<[1], [0], [0], [1], [0, 0, 1, 1], [], []>} : vector<2x256xf32>, vector<256x128xf32>, vector<2x128xf32> -> vector<2x128xf32>
    %c0_18 = arith.constant 0 : index
    %c0_19 = arith.constant 0 : index
    %24 = vector.load %arg8[%c0_18, %c0_19] : memref<2x128xf32, #tpu.memory_space<vmem>>, vector<2x128xf32>
    tpu.vector_store %arg8[%c0_18, %c0_19], %23 {strides = array<i32>} : memref<2x128xf32, #tpu.memory_space<vmem>>, vector<2x128xf32>,
    return
  }
  func.func @transform_0(%arg0: i32) -> (i32, i32) {
    %c0_i32 = arith.constant 0 : i32
    %c0_i32_0 = arith.constant 0 : i32
    return %arg0, %c0_i32 : i32, i32
  }
  func.func @transform_1(%arg0: i32) -> (i32, i32) {
    %c0_i32 = arith.constant 0 : i32
    %c0_i32_0 = arith.constant 0 : i32
    %c0_i32_1 = arith.constant 0 : i32
    return %c0_i32, %c0_i32_0 : i32, i32
  }
  func.func @transform_2(%arg0: i32) -> (i32, i32) {
    %c0_i32 = arith.constant 0 : i32
    %c0_i32_0 = arith.constant 0 : i32
    %c0_i32_1 = arith.constant 0 : i32
    return %c0_i32, %c0_i32_0 : i32, i32
  }
  func.func @transform_3(%arg0: i32) -> (i32, i32) {
    %c0_i32 = arith.constant 0 : i32
    %c0_i32_0 = arith.constant 0 : i32
    %c0_i32_1 = arith.constant 0 : i32
    return %c0_i32, %c0_i32_0 : i32, i32
  }
  func.func @transform_4(%arg0: i32) -> (i32, i32) {
    %c0_i32 = arith.constant 0 : i32
    %c0_i32_0 = arith.constant 0 : i32
    %c0_i32_1 = arith.constant 0 : i32
    return %c0_i32, %c0_i32_0 : i32, i32
  }
  func.func @transform_5(%arg0: i32) -> (i32, i32) {
    %c0_i32 = arith.constant 0 : i32
    %c0_i32_0 = arith.constant 0 : i32
    %c0_i32_1 = arith.constant 0 : i32
    return %c0_i32, %c0_i32_0 : i32, i32
  }
  func.func @transform_6(%arg0: i32) -> (i32, i32) {
    %c0_i32 = arith.constant 0 : i32
    %c0_i32_0 = arith.constant 0 : i32
    %c0_i32_1 = arith.constant 0 : i32
    return %c0_i32, %c0_i32_0 : i32, i32
  }
  func.func @transform_7(%arg0: i32) -> (i32, i32) {
    %c0_i32 = arith.constant 0 : i32
    %c0_i32_0 = arith.constant 0 : i32
    return %arg0, %c0_i32 : i32, i32
  }
}

</mosaic_0001>

<bundles_post_ra>
// kernel: hd_inverse_net.1
= control target key start
LH: loop header
LB: loop body
LE: loop exit
PB: predicated region body
PF: predicated region fallthrough
CT: control target
= control target key end

     0   :  { %s1138_s1 = inlined_call_operand.vmem [shape: f32[128,256], index: 1, kind: input, shape index: {}]   ;;  %s1139_s3 = inlined_call_operand.vmem [shape: f32[256,256], index: 3, kind: input, shape index: {}]   ;;  %s1140_s0 = inlined_call_operand.vmem [shape: f32[2,128], index: 0, kind: input, shape index: {}]   ;;  %s1141_s5 = inlined_call_operand.vmem [shape: f32[256,256], index: 5, kind: input, shape index: {}]   ;;  %s1142_s2 = inlined_call_operand.vmem [shape: f32[1,256], index: 2, kind: input, shape index: {}]   ;;  %s1143_s6 = inlined_call_operand.vmem [shape: f32[256,128], index: 6, kind: input, shape index: {}]   ;;  %s1144_s4 = inlined_call_operand.vmem [shape: f32[1,256], index: 4, kind: input, shape index: {}]   ;;  %s1145_s7 = inlined_call_operand.vmem [shape: f32[2,128], index: 7, kind: output, shape index: {}]  }
   0x1   :  { %v57_v0 = vld [vmem:[%s1138_s1 + $0xf0] sm:$0xff]  ;;  %v55_v1 = vld [vmem:[%s1138_s1 + $0xe0] sm:$0xff]  ;;  %v58_v2 = vld [vmem:[%s1138_s1 + $0xf8] sm:$0xff] }
   0x2   :  { %65 = vmatpush.msra.mxu0 %v57_v0  ;;  %85 = vmatpush.msra.mxu1 %v58_v2  ;;  %v56_v3 = vld [vmem:[%s1138_s1 + $0xe8] sm:$0xff]  ;;  %v53_v4 = vld [vmem:[%s1138_s1 + $0xd0] sm:$0xff]  ;;  %v54_v5 = vld [vmem:[%s1138_s1 + $0xd8] sm:$0xff] }
   0x3   :  { %v51_v6 = vld [vmem:[%s1138_s1 + $0xc0] sm:$0xff]  ;;  %v52_v7 = vld [vmem:[%s1138_s1 + $0xc8] sm:$0xff]  ;;  %v49_v8 = vld [vmem:[%s1138_s1 + $0xb0] sm:$0xff] }
   0x4   :  { %66 = vmatpush.msra.mxu0 %v55_v1  ;;  %86 = vmatpush.msra.mxu1 %v56_v3  ;;  %v50_v9 = vld [vmem:[%s1138_s1 + $0xb8] sm:$0xff]  ;;  %v47_v10 = vld [vmem:[%s1138_s1 + $0xa0] sm:$0xff]  ;;  %v48_v11 = vld [vmem:[%s1138_s1 + $0xa8] sm:$0xff] }
   0x5   :  { %v45_v12 = vld [vmem:[%s1138_s1 + $0x90] sm:$0xff]  ;;  %v46_v13 = vld [vmem:[%s1138_s1 + $0x98] sm:$0xff]  ;;  %v135_v15 = vld [vmem:[%s1139_s3 + $0xe0] sm:$0xff] }
   0x6   :  { %67 = vmatpush.msra.mxu0 %v53_v4  ;;  %87 = vmatpush.msra.mxu1 %v54_v5  ;;  %v137_v14 = vld [vmem:[%s1139_s3 + $0xf0] sm:$0xff]  ;;  %v43_v16 = vld [vmem:[%s1138_s1 + $0x80] sm:$0xff]  ;;  %v44_v17 = vld [vmem:[%s1138_s1 + $0x88] sm:$0xff] }
   0x7   :  { %177 = vmatpush.msra.mxu2 %v137_v14  ;;  %v169_v18 = vld [vmem:[%s1139_s3 + $0x1f0] sm:$0xff]  ;;  %v167_v20 = vld [vmem:[%s1139_s3 + $0x1e0] sm:$0xff]  ;;  %v42_v22 = vld [vmem:[%s1138_s1 + $0x78] sm:$0xff] }
   0x8   :  { %68 = vmatpush.msra.mxu0 %v51_v6  ;;  %88 = vmatpush.msra.mxu1 %v52_v7  ;;  %v133_v19 = vld [vmem:[%s1139_s3 + $0xd0] sm:$0xff]  ;;  %v131_v23 = vld [vmem:[%s1139_s3 + $0xc0] sm:$0xff]  ;;  %v40_v26 = vld [vmem:[%s1138_s1 + $0x68] sm:$0xff] }
   0x9   :  { %v41_v21 = vld [vmem:[%s1138_s1 + $0x70] sm:$0xff]  ;;  %178 = vmatpush.msra.mxu2 %v135_v15  ;;  %197 = vmatpush.msra.mxu3 %v169_v18  ;;  %v39_v25 = vld [vmem:[%s1138_s1 + $0x60] sm:$0xff]  ;;  %v38_v30 = vld [vmem:[%s1138_s1 + $0x58] sm:$0xff] }
   0xa   :  { %69 = vmatpush.msra.mxu0 %v49_v8  ;;  %89 = vmatpush.msra.mxu1 %v50_v9  ;;  %v165_v24 = vld [vmem:[%s1139_s3 + $0x1d0] sm:$0xff]  ;;  %v163_v28 = vld [vmem:[%s1139_s3 + $0x1c0] sm:$0xff]  ;;  %v36_v34 = vld [vmem:[%s1138_s1 + $0x48] sm:$0xff] }
   0xb   :  { %179 = vmatpush.msra.mxu2 %v133_v19  ;;  %198 = vmatpush.msra.mxu3 %v167_v20  ;;  %v129_v27 = vld [vmem:[%s1139_s3 + $0xb0] sm:$0xff]  ;;  %v127_v31 = vld [vmem:[%s1139_s3 + $0xa0] sm:$0xff]  ;;  %v34_v38 = vld [vmem:[%s1138_s1 + $0x38] sm:$0xff] }
   0xc   :  { %70 = vmatpush.msra.mxu0 %v47_v10  ;;  %90 = vmatpush.msra.mxu1 %v48_v11  ;;  %v37_v29 = vld [vmem:[%s1138_s1 + $0x50] sm:$0xff]  ;;  %v35_v33 = vld [vmem:[%s1138_s1 + $0x40] sm:$0xff]  ;;  %v32_v42 = vld [vmem:[%s1138_s1 + $0x28] sm:$0xff] }
   0xd   :  { %180 = vmatpush.msra.mxu2 %v131_v23  ;;  %199 = vmatpush.msra.mxu3 %v165_v24  ;;  %v161_v32 = vld [vmem:[%s1139_s3 + $0x1b0] sm:$0xff]  ;;  %v159_v36 = vld [vmem:[%s1139_s3 + $0x1a0] sm:$0xff]  ;;  %v30_v46 = vld [vmem:[%s1138_s1 + $0x18] sm:$0xff] }
   0xe   :  { %71 = vmatpush.msra.mxu0 %v45_v12  ;;  %91 = vmatpush.msra.mxu1 %v46_v13  ;;  %v125_v35 = vld [vmem:[%s1139_s3 + $0x90] sm:$0xff]  ;;  %v123_v39 = vld [vmem:[%s1139_s3 + $0x80] sm:$0xff]  ;;  %v28_v50 = vld [vmem:[%s1138_s1 + $0x8] sm:$0xff] }
   0xf   :  { %181 = vmatpush.msra.mxu2 %v129_v27  ;;  %200 = vmatpush.msra.mxu3 %v163_v28  ;;  %v33_v37 = vld [vmem:[%s1138_s1 + $0x30] sm:$0xff]  ;;  %v31_v41 = vld [vmem:[%s1138_s1 + $0x20] sm:$0xff]  ;;  %v138_v52 = vld [vmem:[%s1139_s3 + $0xf8] sm:$0xff] }
  0x10   :  { %72 = vmatpush.msra.mxu0 %v43_v16  ;;  %92 = vmatpush.msra.mxu1 %v44_v17  ;;  %v157_v40 = vld [vmem:[%s1139_s3 + $0x190] sm:$0xff]  ;;  %v155_v44 = vld [vmem:[%s1139_s3 + $0x180] sm:$0xff]  ;;  %v170_v53 = vld [vmem:[%s1139_s3 + $0x1f8] sm:$0xff] }
  0x11   :  { %182 = vmatpush.msra.mxu2 %v127_v31  ;;  %201 = vmatpush.msra.mxu3 %v161_v32  ;;  %v121_v43 = vld [vmem:[%s1139_s3 + $0x70] sm:$0xff]  ;;  %v119_v47 = vld [vmem:[%s1139_s3 + $0x60] sm:$0xff]  ;;  %v136_v56 = vld [vmem:[%s1139_s3 + $0xe8] sm:$0xff] }
  0x12   :  { %73 = vmatpush.msra.mxu0 %v41_v21  ;;  %93 = vmatpush.msra.mxu1 %v42_v22  ;;  %v29_v45 = vld [vmem:[%s1138_s1 + $0x10] sm:$0xff]  ;;  %v27_v49 = vld [vmem:[%s1138_s1] sm:$0xff]  ;;  %v168_v57 = vld [vmem:[%s1139_s3 + $0x1e8] sm:$0xff] }
  0x13   :  { %183 = vmatpush.msra.mxu2 %v125_v35  ;;  %202 = vmatpush.msra.mxu3 %v159_v36  ;;  %v153_v48 = vld [vmem:[%s1139_s3 + $0x170] sm:$0xff]  ;;  %v26_v51 = vld [vmem:[%s1140_s0] sm:$0x3]  ;;  %v134_v58 = vld [vmem:[%s1139_s3 + $0xd8] sm:$0xff] }
  0x14   :  { %74 = vmatpush.msra.mxu0 %v39_v25  ;;  %94 = vmatpush.msra.mxu1 %v40_v26  ;;  %v117_v54 = vld [vmem:[%s1139_s3 + $0x50] sm:$0xff]  ;;  %v151_v55 = vld [vmem:[%s1139_s3 + $0x160] sm:$0xff]  ;;  %v166_v59 = vld [vmem:[%s1139_s3 + $0x1d8] sm:$0xff] }
  0x15   :  { %184 = vmatpush.msra.mxu2 %v123_v39  ;;  %203 = vmatpush.msra.mxu3 %v157_v40  ;;  %v132_v60 = vld [vmem:[%s1139_s3 + $0xc8] sm:$0xff]  ;;  %v130_v62 = vld [vmem:[%s1139_s3 + $0xb8] sm:$0xff]  ;;  %v115_v11 = vld [vmem:[%s1139_s3 + $0x40] sm:$0xff] }
  0x16   :  { %75 = vmatpush.msra.mxu0 %v37_v29  ;;  %95 = vmatpush.msra.mxu1 %v38_v30  ;;  %v164_v61 = vld [vmem:[%s1139_s3 + $0x1c8] sm:$0xff]  ;;  %v162_v63 = vld [vmem:[%s1139_s3 + $0x1b8] sm:$0xff]  ;;  %v149_v12 = vld [vmem:[%s1139_s3 + $0x150] sm:$0xff] }
  0x17   :  { %185 = vmatpush.msra.mxu2 %v121_v43  ;;  %204 = vmatpush.msra.mxu3 %v155_v44  ;;  %v128_v0 = vld [vmem:[%s1139_s3 + $0xa8] sm:$0xff]  ;;  %v126_v2 = vld [vmem:[%s1139_s3 + $0x98] sm:$0xff]  ;;  %v113_v15 = vld [vmem:[%s1139_s3 + $0x30] sm:$0xff] }
  0x18   :  { %76 = vmatpush.msra.mxu0 %v35_v33  ;;  %96 = vmatpush.msra.mxu1 %v36_v34  ;;  %v160_v1 = vld [vmem:[%s1139_s3 + $0x1a8] sm:$0xff]  ;;  %v158_v3 = vld [vmem:[%s1139_s3 + $0x198] sm:$0xff]  ;;  %v147_v16 = vld [vmem:[%s1139_s3 + $0x140] sm:$0xff] }
  0x19   :  { %186 = vmatpush.msra.mxu2 %v119_v47  ;;  %205 = vmatpush.msra.mxu3 %v153_v48  ;;  %v124_v4 = vld [vmem:[%s1139_s3 + $0x88] sm:$0xff]  ;;  %v122_v6 = vld [vmem:[%s1139_s3 + $0x78] sm:$0xff]  ;;  %v111_v19 = vld [vmem:[%s1139_s3 + $0x20] sm:$0xff] }
  0x1a   :  { %77 = vmatpush.msra.mxu0 %v33_v37  ;;  %97 = vmatpush.msra.mxu1 %v34_v38  ;;  %v156_v5 = vld [vmem:[%s1139_s3 + $0x188] sm:$0xff]  ;;  %v154_v7 = vld [vmem:[%s1139_s3 + $0x178] sm:$0xff]  ;;  %v145_v20 = vld [vmem:[%s1139_s3 + $0x130] sm:$0xff] }
  0x1b   :  { %187 = vmatpush.msra.mxu2 %v117_v54  ;;  %206 = vmatpush.msra.mxu3 %v151_v55  ;;  %v120_v8 = vld [vmem:[%s1139_s3 + $0x68] sm:$0xff]  ;;  %v118_v10 = vld [vmem:[%s1139_s3 + $0x58] sm:$0xff]  ;;  %v109_v23 = vld [vmem:[%s1139_s3 + $0x10] sm:$0xff] }
  0x1c   :  { %78 = vmatpush.msra.mxu0 %v31_v41  ;;  %98 = vmatpush.msra.mxu1 %v32_v42  ;;  %v152_v9 = vld [vmem:[%s1139_s3 + $0x168] sm:$0xff]  ;;  %v150_v14 = vld [vmem:[%s1139_s3 + $0x158] sm:$0xff]  ;;  %v143_v24 = vld [vmem:[%s1139_s3 + $0x120] sm:$0xff] }
  0x1d   :  { %v116_v13 = vld [vmem:[%s1139_s3 + $0x48] sm:$0xff]  ;;  %188 = vmatpush.msra.mxu2 %v115_v11  ;;  %207 = vmatpush.msra.mxu3 %v149_v12  ;;  %v114_v17 = vld [vmem:[%s1139_s3 + $0x38] sm:$0xff]  ;;  %v107_v27 = vld [vmem:[%s1139_s3] sm:$0xff] }
  0x1e   :  { %79 = vmatpush.msra.mxu0 %v29_v45  ;;  %99 = vmatpush.msra.mxu1 %v30_v46  ;;  %v148_v18 = vld [vmem:[%s1139_s3 + $0x148] sm:$0xff]  ;;  %v146_v22 = vld [vmem:[%s1139_s3 + $0x138] sm:$0xff]  ;;  %v141_v28 = vld [vmem:[%s1139_s3 + $0x110] sm:$0xff] }
  0x1f   :  { %189 = vmatpush.msra.mxu2 %v113_v15  ;;  %208 = vmatpush.msra.mxu3 %v147_v16  ;;  %v112_v21 = vld [vmem:[%s1139_s3 + $0x28] sm:$0xff]  ;;  %v110_v25 = vld [vmem:[%s1139_s3 + $0x18] sm:$0xff]  ;;  %v139_v31 = vld [vmem:[%s1139_s3 + $0x100] sm:$0xff] }
  0x20   :  { %80 = vmatpush.msra.mxu0 %v27_v49  ;;  %100 = vmatpush.msra.mxu1 %v28_v50  ;;  %v144_v26 = vld [vmem:[%s1139_s3 + $0x128] sm:$0xff]  ;;  %v142_v30 = vld [vmem:[%s1139_s3 + $0x118] sm:$0xff]  ;;  %v329_v33 = vld [vmem:[%s1141_s5 + $0x1f0] sm:$0xff] }
  0x21   :  { %81 = vmatmul.f32.vlgmr.msra.gmra.mxu0 %v26_v51  ;;  %101 = vmatmul.f32.vlgmr.msra.gmra.mxu1 %v26_v51  ;;  %v108_v29 = vld [vmem:[%s1139_s3 + $0x8] sm:$0xff]  ;;  %v330_v34 = vld [vmem:[%s1141_s5 + $0x1f8] sm:$0xff]  ;;  %v327_v35 = vld [vmem:[%s1141_s5 + $0x1e0] sm:$0xff] }
  0x22   :  { %217 = vmatpush.msrb.mxu0 %v138_v52  ;;  %237 = vmatpush.msrb.mxu1 %v170_v53  ;;  %v140_v32 = vld [vmem:[%s1139_s3 + $0x108] sm:$0xff]  ;;  %v325_v37 = vld [vmem:[%s1141_s5 + $0x1d0] sm:$0xff]  ;;  %v298_v39 = vld [vmem:[%s1141_s5 + $0xf8] sm:$0xff] }
  0x23   :  { %190 = vmatpush.msra.mxu2 %v111_v19  ;;  %209 = vmatpush.msra.mxu3 %v145_v20  ;;  %v328_v36 = vld [vmem:[%s1141_s5 + $0x1e8] sm:$0xff]  ;;  %v297_v38 = vld [vmem:[%s1141_s5 + $0xf0] sm:$0xff]  ;;  %v326_v40 = vld [vmem:[%s1141_s5 + $0x1d8] sm:$0xff] }
  0x24   :  { %218 = vmatpush.msrb.mxu0 %v136_v56  ;;  %238 = vmatpush.msrb.mxu1 %v168_v57  ;;  %v295_v41 = vld [vmem:[%s1141_s5 + $0xe0] sm:$0xff]  ;;  %v296_v43 = vld [vmem:[%s1141_s5 + $0xe8] sm:$0xff]  ;;  %v293_v44 = vld [vmem:[%s1141_s5 + $0xd0] sm:$0xff] }
  0x25   :  { %191 = vmatpush.msra.mxu2 %v109_v23  ;;  %210 = vmatpush.msra.mxu3 %v143_v24  ;;  %v323_v42 = vld [vmem:[%s1141_s5 + $0x1c0] sm:$0xff]  ;;  %v324_v45 = vld [vmem:[%s1141_s5 + $0x1c8] sm:$0xff]  ;;  %v294_v46 = vld [vmem:[%s1141_s5 + $0xd8] sm:$0xff] }
  0x26   :  { %219 = vmatpush.msrb.mxu0 %v134_v58  ;;  %239 = vmatpush.msrb.mxu1 %v166_v59  ;;  %v321_v47 = vld [vmem:[%s1141_s5 + $0x1b0] sm:$0xff]  ;;  %v291_v48 = vld [vmem:[%s1141_s5 + $0xc0] sm:$0xff]  ;;  %v322_v49 = vld [vmem:[%s1141_s5 + $0x1b8] sm:$0xff] }
  0x27   :  { %192 = vmatpush.msra.mxu2 %v107_v27  ;;  %211 = vmatpush.msra.mxu3 %v141_v28  ;;  %v292_v50 = vld [vmem:[%s1141_s5 + $0xc8] sm:$0xff]  ;;  %v319_v51 = vld [vmem:[%s1141_s5 + $0x1a0] sm:$0xff]  ;;  %v289_v52 = vld [vmem:[%s1141_s5 + $0xb0] sm:$0xff] }
  0x28   :  { %220 = vmatpush.msrb.mxu0 %v132_v60  ;;  %240 = vmatpush.msrb.mxu1 %v164_v61  ;;  %v320_v53 = vld [vmem:[%s1141_s5 + $0x1a8] sm:$0xff]  ;;  %v290_v54 = vld [vmem:[%s1141_s5 + $0xb8] sm:$0xff]  ;;  %v317_v55 = vld [vmem:[%s1141_s5 + $0x190] sm:$0xff] }
  0x29   :  { %212 = vmatpush.msra.mxu3 %v139_v31  ;;  %331 = vmatpush.msrb.mxu2 %v297_v38  ;;  %v318_v56 = vld [vmem:[%s1141_s5 + $0x198] sm:$0xff]  ;;  %v315_v57 = vld [vmem:[%s1141_s5 + $0x180] sm:$0xff]  ;;  %v316_v58 = vld [vmem:[%s1141_s5 + $0x188] sm:$0xff] }
  0x2a   :  { %221 = vmatpush.msrb.mxu0 %v130_v62  ;;  %241 = vmatpush.msrb.mxu1 %v162_v63  ;;  %v59_v59 = vld [vmem:[%s1142_s2] sm:$0x3]  ;;  %v312_v11 = vld [vmem:[%s1141_s5 + $0x168] sm:$0xff]  ;;  %v310_v15 = vld [vmem:[%s1141_s5 + $0x158] sm:$0xff] }
  0x2b   :  { %351 = vmatpush.msrb.mxu3 %v329_v33  ;;  %332 = vmatpush.msrb.mxu2 %v295_v41  ;;  %v61_v60 = vperm.slane %v59_v59, 0  ;;  %v62_v61 = vperm.slane %v59_v59, 1  ;;  %v283_v12 = vld [vmem:[%s1141_s5 + $0x80] sm:$0xff]  ;;  %v281_v16 = vld [vmem:[%s1141_s5 + $0x70] sm:$0xff]  ;;  %v308_v19 = vld [vmem:[%s1141_s5 + $0x148] sm:$0xff] }
  0x2c   :  { %222 = vmatpush.msrb.mxu0 %v128_v0  ;;  %242 = vmatpush.msrb.mxu1 %v160_v1  ;;  %v279_v20 = vld [vmem:[%s1141_s5 + $0x60] sm:$0xff]  ;;  %v306_v23 = vld [vmem:[%s1141_s5 + $0x138] sm:$0xff]  ;;  %v277_v24 = vld [vmem:[%s1141_s5 + $0x50] sm:$0xff] }
  0x2d   :  { %352 = vmatpush.msrb.mxu3 %v327_v35  ;;  %333 = vmatpush.msrb.mxu2 %v293_v44  ;;  %v304_v27 = vld [vmem:[%s1141_s5 + $0x128] sm:$0xff]  ;;  %v275_v28 = vld [vmem:[%s1141_s5 + $0x40] sm:$0xff]  ;;  %v302_v31 = vld [vmem:[%s1141_s5 + $0x118] sm:$0xff] }
  0x2e   :  { %223 = vmatpush.msrb.mxu0 %v126_v2  ;;  %243 = vmatpush.msrb.mxu1 %v158_v3  ;;  %v299_v33 = vld [vmem:[%s1141_s5 + $0x100] sm:$0xff]  ;;  %v300_v35 = vld [vmem:[%s1141_s5 + $0x108] sm:$0xff]  ;;  %v269_v38 = vld [vmem:[%s1141_s5 + $0x10] sm:$0xff] }
  0x2f   :  { %353 = vmatpush.msrb.mxu3 %v325_v37  ;;  %334 = vmatpush.msrb.mxu2 %v291_v48  ;;  %v272_v37 = vld [vmem:[%s1141_s5 + $0x28] sm:$0xff]  ;;  %v428_v44 = vld [vmem:[%s1143_s6 + $0x78] sm:$0xff]  ;;  %v171_v48 = vld [vmem:[%s1144_s4] sm:$0x3] }
  0x30   :  { %224 = vmatpush.msrb.mxu0 %v124_v4  ;;  %244 = vmatpush.msrb.mxu1 %v156_v5  ;;  %v287_v4 = vld [vmem:[%s1141_s5 + $0xa0] sm:$0xff]  ;;  %v313_v5 = vld [vmem:[%s1141_s5 + $0x170] sm:$0xff]  ;;  %v268_v41 = vld [vmem:[%s1141_s5 + $0x8] sm:$0xff] }
  0x31   :  { %354 = vmatpush.msrb.mxu3 %v323_v42  ;;  %335 = vmatpush.msrb.mxu2 %v289_v52  ;;  %v444_v42 = vld [vmem:[%s1143_s6 + $0xf8] sm:$0xff]  ;;  %v174_v52 = vperm.slane %v171_v48, 1 }
  0x32   :  { %225 = vmatpush.msrb.mxu0 %v122_v6  ;;  %245 = vmatpush.msrb.mxu1 %v154_v7  ;;  %v288_v6 = vld [vmem:[%s1141_s5 + $0xa8] sm:$0xff]  ;;  %v314_v7 = vld [vmem:[%s1141_s5 + $0x178] sm:$0xff] }
  0x33   :  { %355 = vmatpush.msrb.mxu3 %v321_v47  ;;  %336 = vmatpush.msrb.mxu2 %v287_v4  ;;  %v426_v47 = vld [vmem:[%s1143_s6 + $0x68] sm:$0xff]  ;;  %v435_v4 = vld [vmem:[%s1143_s6 + $0xb0] sm:$0xff] }
  0x34   :  { %226 = vmatpush.msrb.mxu0 %v120_v8  ;;  %246 = vmatpush.msrb.mxu1 %v152_v9  ;;  %v285_v8 = vld [vmem:[%s1141_s5 + $0x90] sm:$0xff]  ;;  %v311_v9 = vld [vmem:[%s1141_s5 + $0x160] sm:$0xff] }
  0x35   :  { %356 = vmatpush.msrb.mxu3 %v319_v51  ;;  %337 = vmatpush.msrb.mxu2 %v285_v8  ;;  %v440_v51 = vld [vmem:[%s1143_s6 + $0xd8] sm:$0xff] }
  0x36   :  { %227 = vmatpush.msrb.mxu0 %v118_v10  ;;  %247 = vmatpush.msrb.mxu1 %v150_v14  ;;  %v286_v10 = vld [vmem:[%s1141_s5 + $0x98] sm:$0xff]  ;;  %v284_v14 = vld [vmem:[%s1141_s5 + $0x88] sm:$0xff] }
  0x37   :  { %357 = vmatpush.msrb.mxu3 %v317_v55  ;;  %338 = vmatpush.msrb.mxu2 %v283_v12  ;;  %v423_v55 = vld [vmem:[%s1143_s6 + $0x50] sm:$0xff] }
  0x38   :  { %228 = vmatpush.msrb.mxu0 %v116_v13  ;;  %248 = vmatpush.msrb.mxu1 %v148_v18  ;;  %v309_v13 = vld [vmem:[%s1141_s5 + $0x150] sm:$0xff]  ;;  %v282_v18 = vld [vmem:[%s1141_s5 + $0x78] sm:$0xff] }
  0x39   :  { %358 = vmatpush.msrb.mxu3 %v315_v57  ;;  %339 = vmatpush.msrb.mxu2 %v281_v16  ;;  %v438_v57 = vld [vmem:[%s1143_s6 + $0xc8] sm:$0xff]  ;;  %v420_v16 = vld [vmem:[%s1143_s6 + $0x38] sm:$0xff] }
  0x3a   :  { %229 = vmatpush.msrb.mxu0 %v114_v17  ;;  %249 = vmatpush.msrb.mxu1 %v146_v22  ;;  %v307_v17 = vld [vmem:[%s1141_s5 + $0x140] sm:$0xff]  ;;  %v280_v22 = vld [vmem:[%s1141_s5 + $0x68] sm:$0xff] }
  0x3b   :  { %359 = vmatpush.msrb.mxu3 %v313_v5  ;;  %340 = vmatpush.msrb.mxu2 %v279_v20  ;;  %v418_v20 = vld [vmem:[%s1143_s6 + $0x28] sm:$0xff] }
  0x3c   :  { %230 = vmatpush.msrb.mxu0 %v112_v21  ;;  %250 = vmatpush.msrb.mxu1 %v144_v26  ;;  %v305_v21 = vld [vmem:[%s1141_s5 + $0x130] sm:$0xff]  ;;  %v278_v26 = vld [vmem:[%s1141_s5 + $0x58] sm:$0xff] }
  0x3d   :  { %360 = vmatpush.msrb.mxu3 %v311_v9  ;;  %341 = vmatpush.msrb.mxu2 %v277_v24  ;;  %v416_v24 = vld [vmem:[%s1143_s6 + $0x18] sm:$0xff] }
  0x3e   :  { %231 = vmatpush.msrb.mxu0 %v110_v25  ;;  %251 = vmatpush.msrb.mxu1 %v142_v30  ;;  %v303_v25 = vld [vmem:[%s1141_s5 + $0x120] sm:$0xff]  ;;  %v276_v30 = vld [vmem:[%s1141_s5 + $0x48] sm:$0xff] }
  0x3f   :  { %361 = vmatpush.msrb.mxu3 %v309_v13  ;;  %342 = vmatpush.msrb.mxu2 %v275_v28  ;;  %v413_v28 = vld [vmem:[%s1143_s6] sm:$0xff] }
  0x40   :  { %232 = vmatpush.msrb.mxu0 %v108_v29  ;;  %252 = vmatpush.msrb.mxu1 %v140_v32  ;;  %v301_v29 = vld [vmem:[%s1141_s5 + $0x110] sm:$0xff] }
  0x41   :  { %362 = vmatpush.msrb.mxu3 %v307_v17  ;;  %v273_v32 = vld [vmem:[%s1141_s5 + $0x30] sm:$0xff]  ;;  %v433_v17 = vld [vmem:[%s1143_s6 + $0xa0] sm:$0xff] }
  0x42   :  { %391 = vmatpush.msra.mxu1 %v330_v34  ;;  %371 = vmatpush.msra.mxu0 %v298_v39  ;;  %v274_v34 = vld [vmem:[%s1141_s5 + $0x38] sm:$0xff] }
  0x43   :  { %363 = vmatpush.msrb.mxu3 %v305_v21  ;;  %343 = vmatpush.msrb.mxu2 %v273_v32  ;;  %v270_v39 = vld [vmem:[%s1141_s5 + $0x18] sm:$0xff]  ;;  %v431_v21 = vld [vmem:[%s1143_s6 + $0x90] sm:$0xff] }
  0x44   :  { %392 = vmatpush.msra.mxu1 %v328_v36  ;;  %372 = vmatpush.msra.mxu0 %v296_v43  ;;  %v271_v36 = vld [vmem:[%s1141_s5 + $0x20] sm:$0xff]  ;;  %v443_v43 = vld [vmem:[%s1143_s6 + $0xf0] sm:$0xff] }
  0x45   :  { %364 = vmatpush.msrb.mxu3 %v303_v25  ;;  %344 = vmatpush.msrb.mxu2 %v271_v36  ;;  %v429_v25 = vld [vmem:[%s1143_s6 + $0x80] sm:$0xff] }
  0x46   :  { %393 = vmatpush.msra.mxu1 %v326_v40  ;;  %373 = vmatpush.msra.mxu0 %v294_v46  ;;  %v267_v40 = vld [vmem:[%s1141_s5] sm:$0xff]  ;;  %v442_v46 = vld [vmem:[%s1143_s6 + $0xe8] sm:$0xff] }
  0x47   :  { %365 = vmatpush.msrb.mxu3 %v301_v29  ;;  %345 = vmatpush.msrb.mxu2 %v269_v38 }
  0x48   :  { %394 = vmatpush.msra.mxu1 %v324_v45  ;;  %374 = vmatpush.msra.mxu0 %v292_v50  ;;  %v427_v45 = vld [vmem:[%s1143_s6 + $0x70] sm:$0xff]  ;;  %v425_v50 = vld [vmem:[%s1143_s6 + $0x60] sm:$0xff] }
  0x49   :  { %366 = vmatpush.msrb.mxu3 %v299_v33  ;;  %346 = vmatpush.msrb.mxu2 %v267_v40 }
  0x4a   :  { %395 = vmatpush.msra.mxu1 %v322_v49  ;;  %375 = vmatpush.msra.mxu0 %v290_v54  ;;  %v441_v49 = vld [vmem:[%s1143_s6 + $0xe0] sm:$0xff]  ;;  %v439_v54 = vld [vmem:[%s1143_s6 + $0xd0] sm:$0xff] }
  0x4c   :  { %396 = vmatpush.msra.mxu1 %v320_v53  ;;  %376 = vmatpush.msra.mxu0 %v288_v6  ;;  %v424_v53 = vld [vmem:[%s1143_s6 + $0x58] sm:$0xff] }
  0x4e   :  { %397 = vmatpush.msra.mxu1 %v318_v56  ;;  %377 = vmatpush.msra.mxu0 %v286_v10 }
  0x50   :  { %398 = vmatpush.msra.mxu1 %v316_v58  ;;  %378 = vmatpush.msra.mxu0 %v284_v14  ;;  %v421_v14 = vld [vmem:[%s1143_s6 + $0x40] sm:$0xff] }
  0x52   :  { %399 = vmatpush.msra.mxu1 %v314_v7  ;;  %379 = vmatpush.msra.mxu0 %v282_v18  ;;  %v419_v18 = vld [vmem:[%s1143_s6 + $0x30] sm:$0xff] }
  0x54   :  { %400 = vmatpush.msra.mxu1 %v312_v11  ;;  %380 = vmatpush.msra.mxu0 %v280_v22  ;;  %v417_v22 = vld [vmem:[%s1143_s6 + $0x20] sm:$0xff] }
  0x56   :  { %401 = vmatpush.msra.mxu1 %v310_v15  ;;  %381 = vmatpush.msra.mxu0 %v278_v26  ;;  %v434_v15 = vld [vmem:[%s1143_s6 + $0xa8] sm:$0xff]  ;;  %v415_v26 = vld [vmem:[%s1143_s6 + $0x10] sm:$0xff] }
  0x58   :  { %402 = vmatpush.msra.mxu1 %v308_v19  ;;  %382 = vmatpush.msra.mxu0 %v276_v30  ;;  %v432_v19 = vld [vmem:[%s1143_s6 + $0x98] sm:$0xff] }
  0x5a   :  { %403 = vmatpush.msra.mxu1 %v306_v23  ;;  %383 = vmatpush.msra.mxu0 %v274_v34  ;;  %v430_v23 = vld [vmem:[%s1143_s6 + $0x88] sm:$0xff] }
  0x5c   :  { %404 = vmatpush.msra.mxu1 %v304_v27  ;;  %384 = vmatpush.msra.mxu0 %v272_v37  ;;  %v414_v27 = vld [vmem:[%s1143_s6 + $0x8] sm:$0xff] }
  0x5e   :  { %405 = vmatpush.msra.mxu1 %v302_v31  ;;  %385 = vmatpush.msra.mxu0 %v270_v39 }
  0x60   :  { %406 = vmatpush.msra.mxu1 %v300_v35  ;;  %386 = vmatpush.msra.mxu0 %v268_v41 }
  0x9e   :  { %v82_v62 = vpop.f32.mrf.mxu0  ;;  %v102_v63 = vpop.f32.mrf.mxu1 }
  0x9f   :  { %v83_v0 = vadd.f32 %v82_v62, %v61_v60  ;;  %v103_v1 = vadd.f32 %v102_v63, %v62_v61  ;;  %v422_v60 = vld [vmem:[%s1143_s6 + $0x48] sm:$0xff]  ;;  %v437_v61 = vld [vmem:[%s1143_s6 + $0xc0] sm:$0xff]  ;;  %v173_v63 = vperm.slane %v171_v48, 0 }
  0xa1   :  { %490 = vtanh.f32 %v83_v0  ;;  %v436_v0 = vld [vmem:[%s1143_s6 + $0xb8] sm:$0xff] }
  0xa2   :  { %492 = vtanh.f32 %v103_v1 }
  0xa7   :  { %v910_v2 = vpop.eup %490 }
  0xa8   :  { %v912_v3 = vpop.eup %492  ;;  %193 = vmatmul.f32.vlgmr.msra.gmra.mxu2 %v910_v2  ;;  %233 = vmatmul.f32.vlgmr.msrb.gmra.mxu0 %v910_v2  ;;  %v259_v35 = vmul.f32 %v910_v2, %v910_v2 }
  0xa9   :  { %213 = vmatmul.f32.vlgmr.msra.gmra.mxu3 %v912_v3  ;;  %253 = vmatmul.f32.vlgmr.msrb.gmra.mxu1 %v912_v3  ;;  %v260_v29 = vmul.f32 %v912_v3, %v912_v3 }
  0xaa   :  { %465 = vmatpush.msra.mxu3 %v444_v42  ;;  %445 = vmatpush.msra.mxu2 %v428_v44  ;;  %v261_v38 = vsub.f32 1.0, %v259_v35 }
  0xab   :  { %v262_v32 = vsub.f32 1.0, %v260_v29 }
  0xac   :  { %466 = vmatpush.msra.mxu3 %v443_v43  ;;  %446 = vmatpush.msra.mxu2 %v427_v45 }
  0xae   :  { %467 = vmatpush.msra.mxu3 %v442_v46  ;;  %447 = vmatpush.msra.mxu2 %v426_v47 }
  0xb0   :  { %468 = vmatpush.msra.mxu3 %v441_v49  ;;  %448 = vmatpush.msra.mxu2 %v425_v50 }
  0xb2   :  { %469 = vmatpush.msra.mxu3 %v440_v51  ;;  %449 = vmatpush.msra.mxu2 %v424_v53 }
  0xb4   :  { %470 = vmatpush.msra.mxu3 %v439_v54  ;;  %450 = vmatpush.msra.mxu2 %v423_v55 }
  0xb6   :  { %471 = vmatpush.msra.mxu3 %v438_v57  ;;  %451 = vmatpush.msra.mxu2 %v422_v60 }
  0xb8   :  { %472 = vmatpush.msra.mxu3 %v437_v61  ;;  %452 = vmatpush.msra.mxu2 %v421_v14 }
  0xba   :  { %473 = vmatpush.msra.mxu3 %v436_v0  ;;  %453 = vmatpush.msra.mxu2 %v420_v16 }
  0xbc   :  { %474 = vmatpush.msra.mxu3 %v435_v4  ;;  %454 = vmatpush.msra.mxu2 %v419_v18 }
  0xbe   :  { %475 = vmatpush.msra.mxu3 %v434_v15  ;;  %455 = vmatpush.msra.mxu2 %v418_v20 }
  0xc0   :  { %476 = vmatpush.msra.mxu3 %v433_v17  ;;  %456 = vmatpush.msra.mxu2 %v417_v22 }
  0xc2   :  { %477 = vmatpush.msra.mxu3 %v432_v19  ;;  %457 = vmatpush.msra.mxu2 %v416_v24 }
  0xc4   :  { %478 = vmatpush.msra.mxu3 %v431_v21  ;;  %458 = vmatpush.msra.mxu2 %v415_v26 }
  0xc6   :  { %479 = vmatpush.msra.mxu3 %v430_v23  ;;  %459 = vmatpush.msra.mxu2 %v414_v27 }
  0xc8   :  { %480 = vmatpush.msra.mxu3 %v429_v25  ;;  %460 = vmatpush.msra.mxu2 %v413_v28 }
 0x125   :  { %v234_v56 = vpop.f32.mrf.mxu0 }
 0x126   :  { %v235_v58 = vadd.f32 %v234_v56, %v174_v52  ;;  %v254_v59 = vpop.f32.mrf.mxu1 }
 0x128   :  { %v255_v62 = vadd.f32 %v254_v59, %v235_v58 }
 0x12a   :  { %494 = vtanh.f32 %v255_v62 }
 0x12b   :  { %v194_v1 = vpop.f32.mrf.mxu2 }
 0x12c   :  { %v195_v5 = vadd.f32 %v194_v1, %v173_v63  ;;  %v214_v6 = vpop.f32.mrf.mxu3 }
 0x12e   :  { %v215_v7 = vadd.f32 %v214_v6, %v195_v5 }
 0x130   :  { %v495_v8 = vpop.eup %494  ;;  %496 = vtanh.f32 %v215_v7 }
 0x131   :  { %v264_v9 = vmul.f32 %v495_v8, %v495_v8 }
 0x133   :  { %v266_v10 = vsub.f32 1.0, %v264_v9 }
 0x135   :  { %367 = vmatmul.f32.vlgmr.msrb.gmra.mxu3 %v266_v10  ;;  %407 = vmatmul.f32.vlgmr.msra.gmra.mxu1 %v266_v10 }
 0x136   :  { %v497_v11 = vpop.eup %496 }
 0x137   :  { %v263_v12 = vmul.f32 %v497_v11, %v497_v11 }
 0x139   :  { %v265_v13 = vsub.f32 1.0, %v263_v12 }
 0x13b   :  { %347 = vmatmul.f32.vlgmr.msrb.gmra.mxu2 %v265_v13  ;;  %387 = vmatmul.f32.vlgmr.msra.gmra.mxu0 %v265_v13 }
 0x1b2   :  { %v408_v30 = vpop.f32.mrf.mxu1 }
 0x1b8   :  { %v388_v31 = vpop.f32.mrf.mxu0  ;;  %v368_v36 = vpop.f32.mrf.mxu3 }
 0x1b9   :  { %v409_v33 = vadd.f32 %v408_v30, %v388_v31 }
 0x1bb   :  { %v412_v34 = vmul.f32 %v409_v33, %v262_v32 }
 0x1bd   :  { %481 = vmatmul.f32.vlgmr.msra.gmra.mxu3 %v412_v34 }
 0x1be   :  { %v348_v37 = vpop.f32.mrf.mxu2 }
 0x1bf   :  { %v369_v39 = vadd.f32 %v368_v36, %v348_v37 }
 0x1c1   :  { %v411_v40 = vmul.f32 %v369_v39, %v261_v38 }
 0x1c3   :  { %461 = vmatmul.f32.vlgmr.msra.gmra.mxu2 %v411_v40 }
 0x240   :  { %v482_v41 = vpop.f32.mrf.mxu3 }
 0x246   :  { %v462_v42 = vpop.f32.mrf.mxu2 }
 0x247   :  { %v483_v43 = vadd.f32 %v482_v41, %v462_v42 }
 0x249   :  { %485 = vst [vmem:[%s1145_s7] sm:$0x3] %v483_v43 }

</bundles_post_ra>
